<compile_context>
chip_gen: v5e
topology: v5e:2x2
jax: 0.10.0
libtpu: 0.0.40
codegen_flags: <defaults>
</compile_context>

<pallas_src>
import functools

import jax
import jax.numpy as jnp
from jax.experimental import pallas as pl
from jax.experimental.pallas import tpu as pltpu


def _round_up(x, m):
    return (x + m - 1) // m * m


def _pick_time_blocks(T, V):
    """Return (TB_s, TB_m): streaming T-block and in-kernel mixing T-chunk.

    TB_s*V is the lane width of the streamed x/out slab (want 512-1024 lanes,
    a 128-multiple or the full T for unmasked DMA / stores).  TB_m*V is the
    lane width of one mixing matmul chunk (want the SMALLEST 128-multiple so
    the resident operator I_{TB_m} (x) A_eff stays ~(K,128,128) and wasted MXU
    FLOPs are capped at MXU-tile granularity, not slab granularity).
    TB_m always divides TB_s, and TB_s always divides T.
    """
    divs = [d for d in range(1, T + 1) if T % d == 0]
    dense = [d for d in divs if (d * V) % 128 == 0 and d * V <= 256]
    if dense:
        tb_m = dense[0]
    else:
        # TODO(synk): skeleton graphs with awkward V (25 / 17 / 18) have no
        # small 128-multiple chunk; pad V (e.g. 25 -> 32) in the wrapper for a
        # lane-dense path.  Here fall back to the divisor chunk closest to
        # 128 lanes (correct, slightly masked within-VMEM matmuls).
        tb_m = min(divs, key=lambda d: abs(d * V - 128))
    cands = [d for d in divs
             if d % tb_m == 0 and d * V <= 1024
             and ((d * V) % 128 == 0 or d == T)]
    tb_s = max(cands) if cands else T      # full dim is always a legal block
    return tb_s, tb_m


def _unit_gcn_kernel(x_ref, w_ref, a_ref, shift_ref, o_ref, *,
                     K, C_out, C_out_p, n_chunks, Lc):
    """One (batch element, streaming T-block) grid step.

    x_ref     : (1, C_in, L)        lane-dense activation slab, L = TB_s * V
    w_ref     : (K*C_out_p, C_in)   BN-scale-folded 1x1 conv weight (resident)
    a_ref     : (K, Lc, Lc)         I_{TB_m} (x) A_eff  (resident, ~128 lanes)
    shift_ref : (C_out_p, Lc)       folded conv-bias + BN shift (resident)
    o_ref     : (1, C_out, L)       output slab
    """
    x2d = x_ref[0]                                                  # (C_in, L)
    # 1x1 conv over channels for the whole streaming slab: one MXU matmul.
    # TODO(synk): for very small C_in (first ST-GCN layer) the contraction is
    # only C_in deep; fully folding A into W (contraction C_in*V) needs an
    # N,T,(C,V) activation layout and an extra HBM transpose, so it is left
    # to callers that already keep that layout.
    y = jnp.dot(w_ref[...], x2d,
                preferred_element_type=jnp.float32)         # (K*C_out_p, L)

    # GCN vertex mixing on ~128-lane chunks against the small resident
    # block-diagonal operator: K matmuls per chunk, each one MXU tile, with
    # no Kronecker-scale FLOP inflation.  n_chunks is small -> static unroll.
    for c in range(n_chunks):
        lo = c * Lc
        z = jnp.dot(y[:C_out_p, lo:lo + Lc], a_ref[0],
                    preferred_element_type=jnp.float32)
        for k in range(1, K):
            z = z + jnp.dot(y[k * C_out_p:(k + 1) * C_out_p, lo:lo + Lc],
                            a_ref[k], preferred_element_type=jnp.float32)
        # Folded (BN shift + conv bias through A) + ReLU, lane-dense store.
        zz = jnp.maximum(z + shift_ref[...], 0.0)
        o_ref[0, :, lo:lo + Lc] = zz[:C_out].astype(o_ref.dtype)


def unit_gcn_forward(x_nctv, W, b, A, PA, gamma, beta, run_mean, run_var,
                     eps=1e-5, compute_dtype=jnp.float32, out_dtype=None):
    """Forward of unit_gcn (adaptive='importance', conv_pos='pre', no residual).

    x_nctv : (N, C_in, T, V)   PyTorch NCHW convention.
    W      : (K*C_out, C_in)   1x1 conv weight (kernel dims squeezed).
    b      : (K*C_out,)
    A, PA  : (K, V, V)
    gamma, beta, run_mean, run_var : (C_out,)   BN params / running stats.
    compute_dtype : matmul operand dtype.  Use jnp.bfloat16 on v6e/v7x (the
                    kernel is HBM-bound there); accumulation stays f32.
    out_dtype     : output dtype (default: x dtype).  bf16 halves writeback.
    """
    N, C_in, T, V = x_nctv.shape
    K = A.shape[0]
    C_out = W.shape[0] // K
    C_out_p = _round_up(C_out, 8)          # 8-sublane aligned per-subset rows
    out_dtype = x_nctv.dtype if out_dtype is None else out_dtype

    TB_s, TB_m = _pick_time_blocks(T, V)
    L, Lc = TB_s * V, TB_m * V
    n_tb, n_chunks = T // TB_s, TB_s // TB_m

    # ---- parameter glue (tiny, plain JAX) --------------------------------
    A_eff = A * PA                                   # adaptive == 'importance'
    scale = gamma / jnp.sqrt(run_var + eps)          # fold BN (eval mode)
    shift = beta - run_mean * scale
    # TODO(synk): training-mode BatchNorm (batch statistics over N,T,V) is not
    # computed in-kernel; this implements the inference-mode affine transform.

    # Fold BN scale into the conv rows; pad each subset to C_out_p rows so the
    # in-kernel row slices are zero-cost aligned Ref views.
    W3 = W.reshape(K, C_out, C_in) * scale[None, :, None]
    W3 = jnp.pad(W3, ((0, 0), (0, C_out_p - C_out), (0, 0)))
    Wf = W3.reshape(K * C_out_p, C_in).astype(compute_dtype)

    # Fold conv bias + BN shift into one additive constant
    # (bias passes through the mixing as b_{k,c} * sum_v A_eff[k,v,w]).
    colsum = A_eff.sum(axis=1)                                        # (K, V)
    shift_full = shift[:, None] + scale[:, None] * jnp.einsum(
        'kc,kw->cw', b.reshape(K, C_out), colsum)                     # (C_out, V)
    shift_full = jnp.pad(shift_full, ((0, C_out_p - C_out), (0, 0)))
    shift_tiled = jnp.tile(shift_full, (1, TB_m)).astype(jnp.float32)  # (C_out_p, Lc)

    # Small block-diagonal mixing operator: I_{TB_m} (x) A_eff -> (K, Lc, Lc).
    eye = jnp.eye(TB_m, dtype=A_eff.dtype)
    BigA = jnp.einsum('ij,kvw->kivjw', eye, A_eff).reshape(K, Lc, Lc)
    BigA = BigA.astype(compute_dtype)

    # Free (contiguous) reshape: native NCHW layout, no HBM transpose.  Cast
    # only if the caller didn't already hand us compute_dtype activations
    # (keep activations bf16 upstream on v6e/v7x to skip this extra pass).
    x_flat = x_nctv.reshape(N, C_in, T * V)
    if x_flat.dtype != compute_dtype:
        x_flat = x_flat.astype(compute_dtype)

    esz = jnp.dtype(compute_dtype).itemsize
    osz = jnp.dtype(out_dtype).itemsize
    # VMEM budget: 2x buffering of every pipelined operand (streaming AND the
    # constant-index residents) plus f32 intermediates; clamp at 40 MiB so we
    # never request the whole 64 MiB physical VMEM of a v7x TensorCore.
    vmem_need = (2 * C_in * L * esz + 2 * C_out * L * osz
                 + 2 * (K * C_out_p * C_in + K * Lc * Lc) * esz
                 + 2 * C_out_p * Lc * 4
                 + (K * C_out_p * L + C_out_p * Lc) * 4)
    vmem_limit = int(min(max(2 * vmem_need, 32 * 1024 * 1024),
                         40 * 1024 * 1024))

    # True (non-Kronecker) FLOP / byte counts so XLA's scheduler sees the
    # kernel's real cost.
    flops = 2 * N * T * V * K * C_out * C_in + 2 * N * T * K * C_out * V * V
    bytes_accessed = (N * C_in * T * V * esz + N * C_out * T * V * osz
                      + K * C_out_p * C_in * esz + K * Lc * Lc * esz
                      + C_out_p * Lc * 4)
    cost = pl.CostEstimate(flops=int(flops), transcendentals=0,
                           bytes_accessed=int(bytes_accessed))

    out = pl.pallas_call(
        functools.partial(_unit_gcn_kernel, K=K, C_out=C_out, C_out_p=C_out_p,
                          n_chunks=n_chunks, Lc=Lc),
        out_shape=jax.ShapeDtypeStruct((N, C_out, T * V), out_dtype),
        grid=(N, n_tb),
        in_specs=[
            # streaming activation slab (lane-dense, >=128 lanes)
            pl.BlockSpec((1, C_in, L), lambda n, t: (n, 0, t)),
            # resident (constant-index) operands -- now only ~hundreds of KB
            # total, so the default 2-deep pipeline buffering is negligible.
            pl.BlockSpec((K * C_out_p, C_in), lambda n, t: (0, 0)),
            pl.BlockSpec((K, Lc, Lc), lambda n, t: (0, 0, 0)),
            pl.BlockSpec((C_out_p, Lc), lambda n, t: (0, 0)),
        ],
        out_specs=pl.BlockSpec((1, C_out, L), lambda n, t: (n, 0, t)),
        compiler_params=pltpu.CompilerParams(
            dimension_semantics=("parallel", "parallel"),
            vmem_limit_bytes=vmem_limit),
        cost_estimate=cost,
    )(x_flat, Wf, BigA, shift_tiled)

    return out.reshape(N, C_out, T, V)               # free reshape back to NCHW


def unit_gcn_reference(x, W, b, A, PA, gamma, beta, run_mean, run_var,
                       eps=1e-5):
    """Pure-JAX reference mirroring the PyTorch forward (eval-mode BN)."""
    N, C_in, T, V = x.shape
    K = A.shape[0]
    C_out = W.shape[0] // K
    A_eff = A * PA
    y = jnp.einsum('oc,nctv->notv', W, x) + b[None, :, None, None]
    y = y.reshape(N, K, C_out, T, V)
    z = jnp.einsum('nkctv,kvw->nctw', y, A_eff)
    scale = gamma / jnp.sqrt(run_var + eps)
    shift = beta - run_mean * scale
    return jnp.maximum(z * scale[None, :, None, None]
                       + shift[None, :, None, None], 0.0)


if __name__ == "__main__":
    # Small shapes consistent with the module: N=2, C_in=4, C_out=8, K=3
    # subsets, T=8 frames, V=16 vertices.
    N, C_in, C_out, K, T, V = 2, 4, 8, 3, 8, 16

    key = jax.random.PRNGKey(0)
    k_x, k_w, k_b, k_a = jax.random.split(key, 4)

    x = jax.random.normal(k_x, (N, C_in, T, V), dtype=jnp.float32)
    # Conv2d(in_channels, out_channels * K, 1) weight / bias.
    W = 0.1 * jax.random.normal(k_w, (K * C_out, C_in), dtype=jnp.float32)
    b = 0.01 * jax.random.normal(k_b, (K * C_out,), dtype=jnp.float32)
    # Adjacency A and importance parameter PA (PA init'd to 1, as in __init__).
    A = jax.random.uniform(k_a, (K, V, V), dtype=jnp.float32)
    PA = jnp.ones((K, V, V), dtype=jnp.float32)
    # BatchNorm2d(out_channels) fresh init: gamma=1, beta=0, running stats 0/1.
    gamma = jnp.ones((C_out,), jnp.float32)
    beta = jnp.zeros((C_out,), jnp.float32)
    run_mean = jnp.zeros((C_out,), jnp.float32)
    run_var = jnp.ones((C_out,), jnp.float32)

    ref = unit_gcn_reference(x, W, b, A, PA, gamma, beta, run_mean, run_var)

    # f32 path (tight tolerance).
    out = unit_gcn_forward(x, W, b, A, PA, gamma, beta, run_mean, run_var)
    out = jax.block_until_ready(out)
    assert out.shape == (N, C_out, T, V), out.shape
    assert jnp.allclose(out, ref, atol=1e-4, rtol=1e-4), \
        float(jnp.max(jnp.abs(out - ref)))

    # bf16 compute path (recommended on v6e/v7x: halves HBM/VMEM traffic; f32
    # accumulation keeps error bounded but above the f32 tolerance).
    out_bf16 = unit_gcn_forward(x, W, b, A, PA, gamma, beta, run_mean, run_var,
                                compute_dtype=jnp.bfloat16)
    out_bf16 = jax.block_until_ready(out_bf16)
    assert jnp.allclose(out_bf16, ref, atol=5e-2, rtol=5e-2), \
        float(jnp.max(jnp.abs(out_bf16 - ref)))

    print("KERNEL_OK")
</pallas_src>

<mosaic_0001>
module attributes {stable_mosaic.version = 11 : i64} {
  func.func @_unit_gcn_kernel(%arg0: i32, %arg1: i32, %arg2: memref<1x4x128xf32, #tpu.memory_space<vmem>>, %arg3: memref<24x4xf32, #tpu.memory_space<vmem>>, %arg4: memref<3x128x128xf32, #tpu.memory_space<vmem>>, %arg5: memref<8x128xf32, #tpu.memory_space<vmem>>, %arg6: memref<1x8x128xf32, #tpu.memory_space<vmem>>) attributes {dimension_semantics = [#tpu.dimension_semantics<parallel>, #tpu.dimension_semantics<parallel>], iteration_bounds = array<i64: 2, 1>, scalar_prefetch = 0 : i64, scratch_operands = 0 : i64, tpu.core_type = #tpu.core_type<tc>, window_params = [{transform_indices = @transform_0, window_bounds = array<i64: 1, 4, 128>}, {pipeline_mode = #tpu.pipeline_mode<synchronous>, transform_indices = @transform_1, window_bounds = array<i64: 24, 4>}, {pipeline_mode = #tpu.pipeline_mode<synchronous>, transform_indices = @transform_2, window_bounds = array<i64: 3, 128, 128>}, {pipeline_mode = #tpu.pipeline_mode<synchronous>, transform_indices = @transform_3, window_bounds = array<i64: 8, 128>}, {transform_indices = @transform_4, window_bounds = array<i64: 1, 8, 128>}]} {
    %c0 = arith.constant 0 : index
    %c0_0 = arith.constant 0 : index
    %c0_1 = arith.constant 0 : index
    %0 = vector.load %arg2[%c0, %c0_0, %c0_1] : memref<1x4x128xf32, #tpu.memory_space<vmem>>, vector<1x4x128xf32>
    %1 = vector.shape_cast %0 : vector<1x4x128xf32> to vector<4x128xf32>
    %c0_2 = arith.constant 0 : index
    %c0_3 = arith.constant 0 : index
    %2 = vector.load %arg3[%c0_2, %c0_3] : memref<24x4xf32, #tpu.memory_space<vmem>>, vector<24x4xf32>
    %cst = arith.constant dense<0.000000e+00> : vector<24x128xf32>
    %3 = tpu.matmul %2, %1, %cst {dimension_numbers = #tpu.dot_dimension_numbers<[1], [0], [0], [1], [0, 0, 1, 1], [], []>} : vector<24x4xf32>, vector<4x128xf32>, vector<24x128xf32> -> vector<24x128xf32>
    %4 = vector.extract_strided_slice %3 {offsets = [0, 0], sizes = [8, 128], strides = [1, 1]} : vector<24x128xf32> to vector<8x128xf32>
    %c0_4 = arith.constant 0 : index
    %c0_5 = arith.constant 0 : index
    %c0_6 = arith.constant 0 : index
    %5 = vector.load %arg4[%c0_4, %c0_5, %c0_6] : memref<3x128x128xf32, #tpu.memory_space<vmem>>, vector<1x128x128xf32>
    %6 = vector.shape_cast %5 : vector<1x128x128xf32> to vector<128x128xf32>
    %cst_7 = arith.constant dense<0.000000e+00> : vector<8x128xf32>
    %7 = tpu.matmul %4, %6, %cst_7 {dimension_numbers = #tpu.dot_dimension_numbers<[1], [0], [0], [1], [0, 0, 1, 1], [], []>} : vector<8x128xf32>, vector<128x128xf32>, vector<8x128xf32> -> vector<8x128xf32>
    %8 = vector.extract_strided_slice %3 {offsets = [8, 0], sizes = [8, 128], strides = [1, 1]} : vector<24x128xf32> to vector<8x128xf32>
    %c1 = arith.constant 1 : index
    %c0_8 = arith.constant 0 : index
    %c0_9 = arith.constant 0 : index
    %9 = vector.load %arg4[%c1, %c0_8, %c0_9] : memref<3x128x128xf32, #tpu.memory_space<vmem>>, vector<1x128x128xf32>
    %10 = vector.shape_cast %9 : vector<1x128x128xf32> to vector<128x128xf32>
    %cst_10 = arith.constant dense<0.000000e+00> : vector<8x128xf32>
    %11 = tpu.matmul %8, %10, %cst_10 {dimension_numbers = #tpu.dot_dimension_numbers<[1], [0], [0], [1], [0, 0, 1, 1], [], []>} : vector<8x128xf32>, vector<128x128xf32>, vector<8x128xf32> -> vector<8x128xf32>
    %12 = arith.addf %7, %11 : vector<8x128xf32>
    %13 = vector.extract_strided_slice %3 {offsets = [16, 0], sizes = [8, 128], strides = [1, 1]} : vector<24x128xf32> to vector<8x128xf32>
    %c2 = arith.constant 2 : index
    %c0_11 = arith.constant 0 : index
    %c0_12 = arith.constant 0 : index
    %14 = vector.load %arg4[%c2, %c0_11, %c0_12] : memref<3x128x128xf32, #tpu.memory_space<vmem>>, vector<1x128x128xf32>
    %15 = vector.shape_cast %14 : vector<1x128x128xf32> to vector<128x128xf32>
    %cst_13 = arith.constant dense<0.000000e+00> : vector<8x128xf32>
    %16 = tpu.matmul %13, %15, %cst_13 {dimension_numbers = #tpu.dot_dimension_numbers<[1], [0], [0], [1], [0, 0, 1, 1], [], []>} : vector<8x128xf32>, vector<128x128xf32>, vector<8x128xf32> -> vector<8x128xf32>
    %17 = arith.addf %12, %16 : vector<8x128xf32>
    %c0_14 = arith.constant 0 : index
    %c0_15 = arith.constant 0 : index
    %18 = vector.load %arg5[%c0_14, %c0_15] : memref<8x128xf32, #tpu.memory_space<vmem>>, vector<8x128xf32>
    %19 = arith.addf %17, %18 : vector<8x128xf32>
    %cst_16 = arith.constant 0.000000e+00 : f32
    %20 = vector.broadcast %cst_16 : f32 to vector<8x128xf32>
    %21 = arith.maximumf %19, %20 : vector<8x128xf32>
    %c0_17 = arith.constant 0 : index
    %c0_18 = arith.constant 0 : index
    %c0_19 = arith.constant 0 : index
    %22 = vector.load %arg6[%c0_17, %c0_18, %c0_19] : memref<1x8x128xf32, #tpu.memory_space<vmem>>, vector<1x8x128xf32>
    %23 = vector.shape_cast %22 : vector<1x8x128xf32> to vector<8x128xf32>
    %24 = vector.shape_cast %21 : vector<8x128xf32> to vector<1x8x128xf32>
    tpu.vector_store %arg6[%c0_17, %c0_18, %c0_19], %24 {strides = array<i32>} : memref<1x8x128xf32, #tpu.memory_space<vmem>>, vector<1x8x128xf32>,
    return
  }
  func.func @transform_0(%arg0: i32, %arg1: i32) -> (i32, i32, i32) {
    %c0_i32 = arith.constant 0 : i32
    %c0_i32_0 = arith.constant 0 : i32
    return %arg0, %c0_i32, %arg1 : i32, i32, i32
  }
  func.func @transform_1(%arg0: i32, %arg1: i32) -> (i32, i32) {
    %c0_i32 = arith.constant 0 : i32
    %c0_i32_0 = arith.constant 0 : i32
    %c0_i32_1 = arith.constant 0 : i32
    return %c0_i32, %c0_i32_0 : i32, i32
  }
  func.func @transform_2(%arg0: i32, %arg1: i32) -> (i32, i32, i32) {
    %c0_i32 = arith.constant 0 : i32
    %c0_i32_0 = arith.constant 0 : i32
    %c0_i32_1 = arith.constant 0 : i32
    %c0_i32_2 = arith.constant 0 : i32
    return %c0_i32, %c0_i32_0, %c0_i32_1 : i32, i32, i32
  }
  func.func @transform_3(%arg0: i32, %arg1: i32) -> (i32, i32) {
    %c0_i32 = arith.constant 0 : i32
    %c0_i32_0 = arith.constant 0 : i32
    %c0_i32_1 = arith.constant 0 : i32
    return %c0_i32, %c0_i32_0 : i32, i32
  }
  func.func @transform_4(%arg0: i32, %arg1: i32) -> (i32, i32, i32) {
    %c0_i32 = arith.constant 0 : i32
    %c0_i32_0 = arith.constant 0 : i32
    return %arg0, %c0_i32, %arg1 : i32, i32, i32
  }
}

</mosaic_0001>

<bundles_post_ra>
// kernel: tpu_custom_call.1
= control target key start
LH: loop header
LB: loop body
LE: loop exit
PB: predicated region body
PF: predicated region fallthrough
CT: control target
= control target key end

     0   :  { %9 = vsyncpa [#allocation3], 0  ;;  %s836_s0 = inlined_call_operand.vmem [shape: f32[2,4,128], index: 0, kind: input, shape index: {}]   ;;  %s837_s1 = inlined_call_operand.vmem [shape: f32[24,4], index: 1, kind: input, shape index: {}]   ;;  %s838_s2 = inlined_call_operand.hbm [shape: f32[3,128,128], index: 2, kind: input, shape index: {}]   ;;  %s839_s3 = inlined_call_operand.vmem [shape: f32[8,128], index: 3, kind: input, shape index: {}]   ;;  %s840_s4 = inlined_call_operand.hbm [shape: f32[2,8,128], index: 4, kind: output, shape index: {}]  }
   0x1   :  { %10 = vsyncpa [#allocation4], 0 }
   0x2   :  { %12 = vsyncpa [#allocation4 + $0x1], 0  ;;  %s721_s15 = smov 0   ;;  %s723_s16 = smov 0  }
   0x3   :  { %s725_s17 = smov 0   ;;  %s727_s18 = smov 0  }
   0x4   :  { %s729_s19 = smov 0   ;;  %s731_s20 = smov 0  }
   0x5 LB: > { %s494_s21 = sadd.s32 4294967295, %s691_s20   ;;  %s495_s22 = sadd.s32 4294967294, %s691_s20   ;;  %s691_s20 = sphi %s731_s20, %s18_s20   ;;  %s687_s19 = sphi %s729_s19, %s847_s19   ;;  %s683_s18 = sphi %s727_s18, %s846_s18   ;;  %s679_s17 = sphi %s725_s17, %s845_s17   ;;  %s675_s16 = sphi %s723_s16, %s844_s16   ;;  %s671_s15 = sphi %s721_s15, %s843_s15  }
   0x6   : > { %s30_s23 = sadd.s32 1, %s687_s19  ;;  %s130_s24 = sadd.s32 1, %s679_s17 }
   0x7   : > { %p32_p0 = scmp.ge.s32.totalorder %s30_s23, 2  ;;  %p140_p1 = scmp.ne.s32.totalorder %s679_s17, %s675_s16 }
   0x8   : > { %p141_p2 = scmp.eq.s32.totalorder %s494_s21, 1  ;;  %p146_p3 = scmp.ne.s32.totalorder %s675_s16, %s671_s15 }
   0x9   : > { %s849_s23 = smov (%p32_p0, %s30_s23), 0  ;;  %p147_p5 = scmp.eq.s32.totalorder %s495_s22, 1 }
   0xa   : > { %p761_p4 = por %p141_p2, %p140_p1  ;;  %s125_s26 = ssub.s32 %s687_s19, %s849_s23 }
   0xb   : > { %p496_p6 = scmp.ge.s32.totalorder %s691_s20, 1  ;;  %p128_p7 = scmp.eq.s32.totalorder %s125_s26, 0 }
   0xc   : > { %p768_p8 = por %p147_p5, %p146_p3  ;;  %p154_p9 = scmp.lt.s32.totalorder %s691_s20, 3 }
   0xd   : > { %s774_s28 = scalar_select %p128_p7, %s679_s17, %s130_s24  }
   0xe   : > { %p155_p10 = pnand %p496_p6, %p154_p9  ;;  %p525_p11 = scmp.eq.s32.totalorder %s494_s21, 0 }
   0xf   : > { %s168_s5 = sshll.u32 %s838_s2, 4  ;;  %s693_s6 = smov [#allocation2]   ;;  %s169_s5 = int_to_ptr.hbm [resolvable:$true] %s168_s5 }
  0x10   : > { %p517_p12 = pneg %p155_p10  ;;  %s170_s7 = sshll.u32 %s693_s6, 4  ;;  %s171_s7 = int_to_ptr.vmem [resolvable:$true] %s170_s7 }
  0x11   : > { %s694_s8 = smov 128   ;;  %s695_s9 = smov 8  }
  0x12   : > { %p518_p13 = pnand %p525_p11, %p517_p12  ;;  %199 = sbr.rel (%p155_p10) target bundleno = 315 (0x13b), region = 36 }
  0x14   : > { %520 = dma.hbm_to_vmem [thread:$0]  (!%p518_p13), %s169_s5, 6144, %s171_s7, [#allocation3], %s694_s8, %s694_s8, %s695_s9  }
  0x17   : > { %662 = dma.done.wait (%p525_p11), [#allocation3], 6144  }
  0x18   : > { %664 = vsyncadd (%p525_p11), [#allocation3], 4294961152  ;;  %p228_p0 = scmp.lt.s32.totalorder %s683_s18, 1  ;;  %vm249_vm0 = vcmask 1043456   ;;  %vm239_vm1 = vcmask 31744   ;;  %v236_v1 = vld [vmem:[%s837_s1] sm:$0xff] }
  0x19   : > { %v294_v2 = vld [vmem:[#allocation2 + $0x78] sm:$0xff]  ;;  %v293_v3 = vld [vmem:[#allocation2 + $0x70] sm:$0xff]  ;;  %v292_v5 = vld [vmem:[#allocation2 + $0x68] sm:$0xff]  ;;  %s225_s5 = sand.u32 1, %s675_s16   ;;  %s508_s7 = sshll.u32 %s683_s18, 3 }
  0x1a   : > { %s229_s10 = scalar_select %p228_p0, %s683_s18, 1  ;;  %332 = vmatpush.msra.mxu2 %v294_v2  ;;  %v311_v4 = vld [vmem:[#allocation2 + $0xf8] sm:$0xff]  ;;  %v310_v6 = vld [vmem:[#allocation2 + $0xf0] sm:$0xff]  ;;  %v309_v7 = vld [vmem:[#allocation2 + $0xe8] sm:$0xff] }
  0x1b   : > { %312 = vmatpush.msra.mxu1 %v311_v4  ;;  %v291_v8 = vld [vmem:[#allocation2 + $0x60] sm:$0xff]  ;;  %v368_v10 = vld [vmem:[#allocation2 + $0x178] sm:$0xff]  ;;  %v237_v11 = vld [vmem:[%s837_s1 + $0x8] sm:$0xff]  ;;  %s501_s6 = sshll.u32 %s225_s5, 3  ;;  %s395_s18 = scalar_lea.sflag [#allocation4], %s225_s5 }
  0x1c   : > { %s502_s11 = sshll.u32 %s229_s10, 2  ;;  %333 = vmatpush.msra.mxu2 %v293_v3  ;;  %v308_v9 = vld [vmem:[#allocation2 + $0xe0] sm:$0xff]  ;;  %v290_v12 = vld [vmem:[#allocation2 + $0x58] sm:$0xff]  ;;  %369 = vmatpush.msra.mxu3 %v368_v10  ;;  %v367_v13 = vld [vmem:[#allocation2 + $0x170] sm:$0xff]  ;;  %s406_s10 = scalar_lea.hbm %s840_s4, %s508_s7 }
  0x1d   : > { %s234_s14 = scalar_lea.vmem %s836_s0, %s502_s11  ;;  %313 = vmatpush.msra.mxu1 %v310_v6  ;;  %v307_v14 = vld [vmem:[#allocation2 + $0xd8] sm:$0xff]  ;;  %v366_v15 = vld [vmem:[#allocation2 + $0x168] sm:$0xff]  ;;  %v289_v16 = vld [vmem:[#allocation2 + $0x50] sm:$0xff]  ;;  %s227_s13 = scalar_lea.vmem [#allocation5], %s501_s6 }
  0x1e   : > { %v235_v0 = vld [vmem:[%s234_s14] sm:$0xf]  ;;  %334 = vmatpush.msra.mxu2 %v292_v5  ;;  %370 = vmatpush.msra.mxu3 %v367_v13  ;;  %v306_v17 = vld [vmem:[#allocation2 + $0xd0] sm:$0xff]  ;;  %v288_v19 = vld [vmem:[#allocation2 + $0x48] sm:$0xff]  ;;  %s408_s14 = sshll.u32 %s227_s13, 4  ;;  %s410_s21 = sshll.u32 %s406_s10, 4  ;;  %s409_s14 = int_to_ptr.vmem [resolvable:$true] %s408_s14  ;;  %s411_s21 = int_to_ptr.hbm [resolvable:$true] %s410_s21 }
  0x1f   : > { %503 = vmatpush.msk.msra.mxu0 %vm249_vm0, %v235_v0  ;;  %314 = vmatpush.msra.mxu1 %v309_v7  ;;  %v365_v18 = vld [vmem:[#allocation2 + $0x160] sm:$0xff]  ;;  %v305_v20 = vld [vmem:[#allocation2 + $0xc8] sm:$0xff]  ;;  %v364_v21 = vld [vmem:[#allocation2 + $0x158] sm:$0xff]  ;;  %s623_s22 = sshra.s32 %s411_s21, 4  ;;  %s629_s30 = scalar_lea.hbm %s840_s4, 16  ;;  %s624_s22 = int_to_ptr.hbm [resolvable:$true] %s623_s22 }
  0x20   : > { %504 = vmatmul.msk.f32.vlgmr.msra.gmra.mxu0 %vm239_vm1, %v236_v1  ;;  %335 = vmatpush.msra.mxu2 %v291_v8  ;;  %v287_v22 = vld [vmem:[#allocation2 + $0x40] sm:$0xff]  ;;  %v363_v24 = vld [vmem:[#allocation2 + $0x150] sm:$0xff]  ;;  %v286_v26 = vld [vmem:[#allocation2 + $0x38] sm:$0xff]  ;;  %s625_s24 = scalar_lea.hbm %s624_s22, 8  ;;  %p630_p5 = scmp.lt.s32.totalorder %s624_s22, %s840_s4 }
  0x21   : > { %315 = vmatpush.msra.mxu1 %v308_v9  ;;  %371 = vmatpush.msra.mxu3 %v366_v15  ;;  %v304_v23 = vld [vmem:[#allocation2 + $0xc0] sm:$0xff]  ;;  %v238_v25 = vld [vmem:[%s837_s1 + $0x10] sm:$0xff]  ;;  %v303_v27 = vld [vmem:[#allocation2 + $0xb8] sm:$0xff]  ;;  %p626_p1 = scmp.ne.s32.totalorder %s624_s22, %s625_s24  ;;  %p631_p6 = scmp.lt.s32.totalorder %s629_s30, %s625_s24 }
  0x22   : > { %336 = vmatpush.msra.mxu2 %v290_v12  ;;  %v362_v28 = vld [vmem:[#allocation2 + $0x148] sm:$0xff]  ;;  %v285_v29 = vld [vmem:[#allocation2 + $0x30] sm:$0xff]  ;;  %v283_v33 = vld [vmem:[#allocation2 + $0x20] sm:$0xff] }
  0x23   : > { %316 = vmatpush.msra.mxu1 %v307_v14  ;;  %372 = vmatpush.msra.mxu3 %v365_v18  ;;  %v302_v30 = vld [vmem:[#allocation2 + $0xb0] sm:$0xff]  ;;  %v284_v31 = vld [vmem:[#allocation2 + $0x28] sm:$0xff]  ;;  %v282_v34 = vld [vmem:[#allocation2 + $0x18] sm:$0xff]  ;;  %p627_p2 = pnand %p626_p1, %p761_p4  ;;  %p632_p7 = por %p631_p6, %p630_p5 }
  0x24   : > { %337 = vmatpush.msra.mxu2 %v289_v16  ;;  %v301_v32 = vld [vmem:[#allocation2 + $0xa8] sm:$0xff]  ;;  %v281_v35 = vld [vmem:[#allocation2 + $0x10] sm:$0xff]  ;;  %v300_v37 = vld [vmem:[#allocation2 + $0xa0] sm:$0xff] }
  0x25   : > { %317 = vmatpush.msra.mxu1 %v306_v17  ;;  %373 = vmatpush.msra.mxu3 %v364_v21  ;;  %v280_v36 = vld [vmem:[#allocation2 + $0x8] sm:$0xff]  ;;  %v279_v38 = vld [vmem:[#allocation2] sm:$0xff]  ;;  %v299_v40 = vld [vmem:[#allocation2 + $0x98] sm:$0xff]  ;;  %p628_p3 = pneg %p627_p2 }
  0x26   : > { %338 = vmatpush.msra.mxu2 %v288_v19  ;;  %v361_v39 = vld [vmem:[#allocation2 + $0x140] sm:$0xff]  ;;  %v360_v41 = vld [vmem:[#allocation2 + $0x138] sm:$0xff]  ;;  %v298_v42 = vld [vmem:[#allocation2 + $0x90] sm:$0xff] }
  0x27   : > { %318 = vmatpush.msra.mxu1 %v305_v20  ;;  %374 = vmatpush.msra.mxu3 %v363_v24  ;;  %v359_v43 = vld [vmem:[#allocation2 + $0x130] sm:$0xff]  ;;  %v297_v44 = vld [vmem:[#allocation2 + $0x88] sm:$0xff]  ;;  %v296_v46 = vld [vmem:[#allocation2 + $0x80] sm:$0xff]  ;;  %p633_p9 = pnand %p632_p7, %p628_p3 }
  0x28   : > { %505 = vmatmul.msk.f32.gmra.mxu0 %vm239_vm1, %v237_v11  ;;  %339 = vmatpush.msra.mxu2 %v287_v22  ;;  %v358_v45 = vld [vmem:[#allocation2 + $0x128] sm:$0xff]  ;;  %v357_v47 = vld [vmem:[#allocation2 + $0x120] sm:$0xff]  ;;  %v356_v48 = vld [vmem:[#allocation2 + $0x118] sm:$0xff] }
  0x29   : > { %319 = vmatpush.msra.mxu1 %v304_v23  ;;  %375 = vmatpush.msra.mxu3 %v362_v28  ;;  %v355_v49 = vld [vmem:[#allocation2 + $0x110] sm:$0xff]  ;;  %v354_v50 = vld [vmem:[#allocation2 + $0x108] sm:$0xff]  ;;  %v353_v51 = vld [vmem:[#allocation2 + $0x100] sm:$0xff] }
  0x2a   : > { %340 = vmatpush.msra.mxu2 %v286_v26  ;;  %v390_v59 = vld [vmem:[%s839_s3] sm:$0xff] }
  0x2b   : > { %320 = vmatpush.msra.mxu1 %v303_v27  ;;  %376 = vmatpush.msra.mxu3 %v361_v39 }
  0x2c   : > { %341 = vmatpush.msra.mxu2 %v285_v29 }
  0x2d   : > { %321 = vmatpush.msra.mxu1 %v302_v30  ;;  %377 = vmatpush.msra.mxu3 %v360_v41 }
  0x2e   : > { %342 = vmatpush.msra.mxu2 %v284_v31 }
  0x2f   : > { %322 = vmatpush.msra.mxu1 %v301_v32  ;;  %378 = vmatpush.msra.mxu3 %v359_v43 }
  0x30   : > { %506 = vmatmul.msk.f32.gmra.mxu0 %vm239_vm1, %v238_v25  ;;  %343 = vmatpush.msra.mxu2 %v283_v33 }
  0x31   : > { %323 = vmatpush.msra.mxu1 %v300_v37  ;;  %379 = vmatpush.msra.mxu3 %v358_v45 }
  0x32   : > { %344 = vmatpush.msra.mxu2 %v282_v34 }
  0x33   : > { %324 = vmatpush.msra.mxu1 %v299_v40  ;;  %380 = vmatpush.msra.mxu3 %v357_v47 }
  0x34   : > { %345 = vmatpush.msra.mxu2 %v281_v35 }
  0x35   : > { %325 = vmatpush.msra.mxu1 %v298_v42  ;;  %381 = vmatpush.msra.mxu3 %v356_v48 }
  0x36   : > { %346 = vmatpush.msra.mxu2 %v280_v36 }
  0x37   : > { %326 = vmatpush.msra.mxu1 %v297_v44  ;;  %382 = vmatpush.msra.mxu3 %v355_v49 }
  0x38   : > { %347 = vmatpush.msra.mxu2 %v279_v38 }
  0x39   : > { %327 = vmatpush.msra.mxu1 %v296_v46  ;;  %383 = vmatpush.msra.mxu3 %v354_v50 }
  0x3b   : > { %384 = vmatpush.msra.mxu3 %v353_v51 }
  0x9d   : > { %v270_v52 = vpop.f32.mrf.mxu0 }
  0x9e   : > { %348 = vmatmul.f32.vlgmr.msra.gmra.mxu2 %v270_v52 }
  0xa5   : > { %v273_v53 = vpop.f32.mrf.mxu0 }
  0xa6   : > { %328 = vmatmul.f32.vlgmr.msra.gmra.mxu1 %v273_v53 }
  0xad   : > { %v276_v54 = vpop.f32.mrf.mxu0 }
  0xae   : > { %385 = vmatmul.f32.vlgmr.msra.gmra.mxu3 %v276_v54 }
 0x121   : > { %v349_v56 = vpop.f32.mrf.mxu2 }
 0x123   : > { %v329_v55 = vpop.f32.mrf.mxu1 }
 0x124   : > { %v350_v57 = vadd.f32 %v349_v56, %v329_v55 }
 0x131   : > { %v386_v58 = vpop.f32.mrf.mxu3 }
 0x132   : > { %v389_v60 = vadd.f32 %v386_v58, %v350_v57 }
 0x134   : > { %v391_v61 = vadd.f32 %v390_v59, %v389_v60 }
 0x136   : > { %v392_v62 = vmax.f32 %v391_v61, 0.0 }
 0x138   : > { %393 = vst [vmem:[%s227_s13] sm:$0xff] %v392_v62 }
 0x139   : > { %636 = shalt.err (!%p633_p9)
}
 0x13a   : > { %515 = dma.vmem_to_hbm [thread:$0]  (%p761_p4), %s409_s14, 128, %s411_s21, %s395_s18  }
 0x13b PF: > { %p527_p10 = scmp.ge.s32.totalorder %s691_s20, 2  ;;  %s422_s5 = sand.u32 1, %s671_s15  }
 0x13c   : > { %s423_s8 = scalar_lea.sflag [#allocation4], %s422_s5 }
 0x13d   : > { %p522_p11 = pnand %p527_p10, %p768_p8 }
 0x13f   : > { %p523_p12 = pneg %p522_p11 }
 0x141   : > { %666 = dma.done.wait (%p523_p12), %s423_s8, 128  }
 0x142   : > { %668 = vsyncadd (%p523_p12), %s423_s8, 4294967168  ;;  %s18_s20 = sadd.s32 1, %s691_s20   ;;  %s843_s15 = smov %s675_s16 }
 0x143   : > { %p15_p13 = scmp.ge.s32.totalorder %s18_s20, 4   ;;  %s844_s16 = smov %s679_s17 }
 0x144   : > { %s845_s17 = smov %s774_s28  ;;  %s846_s18 = smov %s687_s19 }
 0x145   : > { %s847_s19 = smov %s849_s23  ;;  %17 = sbr.rel (!%p15_p13) target bundleno = 5 (0x5), region = 78 }
 0x14a   :  { %429 = vsyncpa [#allocation3], 1 }
 0x14b   :  { %431 = vsyncpa [#allocation3 + $0x1], 1 }
 0x14c   :  { %432 = vsyncpa [#allocation4], 1 }
 0x14d   :  { %434 = vsyncpa [#allocation4 + $0x1], 1 }

</bundles_post_ra>
